<compile_context>
chip_gen: v7x
topology: tpu7x:2x2x1
jax: 0.10.0
libtpu: 0.0.40
codegen_flags: <defaults>
</compile_context>

<pallas_src>
import functools

import jax
import jax.numpy as jnp
from jax.experimental import pallas as pl
from jax.experimental.pallas import tpu as pltpu


def _round_up(x: int, m: int) -> int:
    return (x + m - 1) // m * m


def _double_conv_kernel(x_ref, w1_ref, b1_ref, w2_ref, b2_ref, mask_ref,
                        o_ref, mid_ref, *, Wp, M):
    """Fused conv3x3+ReLU -> conv3x3+ReLU on one image in padded-flat layout.

    x_ref   : (1, C_in, Lpad)   zero-padded image, (H+2)*(W+2) flattened
    w1_ref  : (9, C_out, C_in)  tap t = dy*3+dx  ->  weight[:, :, dy, dx]
    b1_ref  : (C_out, 1)
    w2_ref  : (9, C_out, C_out)
    b2_ref  : (C_out, 1)
    mask_ref: (1, M)            1.0 on real image columns, 0.0 on pad gutters
    o_ref   : (1, C_out, Lpad)  output in the same padded-flat layout
    mid_ref : (C_out, Lpad)     VMEM scratch holding the intermediate
    """
    c_out = o_ref.shape[1]

    # ---------------- conv1 + bias + ReLU ----------------
    acc = jnp.zeros((c_out, M), jnp.float32)
    for dy in range(3):
        for dx in range(3):
            off = dy * Wp + dx
            tap = w1_ref[dy * 3 + dx]                 # (C_out, C_in)
            sl = x_ref[0, :, off:off + M]             # (C_in, M)
            acc = acc + jnp.dot(tap, sl, preferred_element_type=jnp.float32)
    acc = jnp.maximum(acc + b1_ref[...], 0.0)
    # Zero the left/right pad-gutter columns so conv2 sees true zero padding.
    acc = acc * mask_ref[...]

    # Stash intermediate in padded-flat layout; everything outside the written
    # slab (top/bottom pad rows + tail) stays zero.
    mid_ref[...] = jnp.zeros_like(mid_ref)
    mid_ref[:, Wp + 1:Wp + 1 + M] = acc

    # ---------------- conv2 + bias + ReLU ----------------
    acc2 = jnp.zeros((c_out, M), jnp.float32)
    for dy in range(3):
        for dx in range(3):
            off = dy * Wp + dx
            tap = w2_ref[dy * 3 + dx]                 # (C_out, C_out)
            sl = mid_ref[:, off:off + M]              # (C_out, M)
            acc2 = acc2 + jnp.dot(tap, sl, preferred_element_type=jnp.float32)
    acc2 = jnp.maximum(acc2 + b2_ref[...], 0.0)

    o_ref[...] = jnp.zeros_like(o_ref)
    o_ref[0, :, Wp + 1:Wp + 1 + M] = acc2.astype(o_ref.dtype)


def double_convolution(x, w1, b1, w2, b2):
    """Conv3x3(pad=1) -> ReLU -> Conv3x3(pad=1) -> ReLU on an NCHW tensor."""
    N, C_in, H, W = x.shape
    C_out = w1.shape[0]
    assert w1.shape == (C_out, C_in, 3, 3)
    assert w2.shape == (C_out, C_out, 3, 3)

    Hp, Wp = H + 2, W + 2
    Lcore = Hp * Wp                       # flattened padded plane
    M = H * Wp                            # flat length of the computed slab
    Lpad = _round_up(Lcore + 2, 128)      # lane-dense last dim (+2 slack for taps)

    # --- wrapper glue: zero-pad + contiguous reshape only (no transposes) ---
    xp = jnp.pad(x, ((0, 0), (0, 0), (1, 1), (1, 1)))
    xf = jnp.pad(xp.reshape(N, C_in, Lcore),
                 ((0, 0), (0, 0), (0, Lpad - Lcore))).astype(jnp.float32)

    # Tiny weight rearrangement: tap-major (9, C_out, C_in/out).
    w1t = jnp.transpose(w1, (2, 3, 0, 1)).reshape(9, C_out, C_in)
    w2t = jnp.transpose(w2, (2, 3, 0, 1)).reshape(9, C_out, C_out)
    b1c = b1.reshape(C_out, 1).astype(jnp.float32)
    b2c = b2.reshape(C_out, 1).astype(jnp.float32)

    # 1.0 on real image columns, 0.0 on left/right pad gutters of each row.
    mask = ((jnp.arange(M) % Wp) < W).astype(jnp.float32).reshape(1, M)

    kernel = functools.partial(_double_conv_kernel, Wp=Wp, M=M)

    of = pl.pallas_call(
        kernel,
        out_shape=jax.ShapeDtypeStruct((N, C_out, Lpad), jnp.float32),
        grid_spec=pltpu.PrefetchScalarGridSpec(
            num_scalar_prefetch=0,
            grid=(N,),
            in_specs=[
                pl.BlockSpec((1, C_in, Lpad), lambda n: (n, 0, 0)),   # x
                pl.BlockSpec((9, C_out, C_in), lambda n: (0, 0, 0)),  # w1
                pl.BlockSpec((C_out, 1), lambda n: (0, 0)),           # b1
                pl.BlockSpec((9, C_out, C_out), lambda n: (0, 0, 0)), # w2
                pl.BlockSpec((C_out, 1), lambda n: (0, 0)),           # b2
                pl.BlockSpec((1, M), lambda n: (0, 0)),               # mask
            ],
            out_specs=pl.BlockSpec((1, C_out, Lpad), lambda n: (n, 0, 0)),
            scratch_shapes=[pltpu.VMEM((C_out, Lpad), jnp.float32)],
        ),
        compiler_params=pltpu.CompilerParams(
            dimension_semantics=("parallel",),
        ),
    )(xf, w1t, b1c, w2t, b2c, mask)

    # Drop padding: (N, C_out, Lpad) -> (N, C_out, H, W).
    out = of[:, :, :Lcore].reshape(N, C_out, Hp, Wp)[:, :, 1:H + 1, 1:W + 1]
    return out


def _reference(x, w1, b1, w2, b2):
    dn = ("NCHW", "OIHW", "NCHW")
    y = jax.lax.conv_general_dilated(x, w1, (1, 1), "SAME",
                                     dimension_numbers=dn)
    y = jnp.maximum(y + b1[None, :, None, None], 0.0)
    y = jax.lax.conv_general_dilated(y, w2, (1, 1), "SAME",
                                     dimension_numbers=dn)
    y = jnp.maximum(y + b2[None, :, None, None], 0.0)
    return y


if __name__ == "__main__":
    key = jax.random.PRNGKey(0)
    k1, k2, k3, k4, k5 = jax.random.split(key, 5)

    N, C_in, C_out, H, W = 2, 4, 8, 16, 16
    x = jax.random.normal(k1, (N, C_in, H, W), dtype=jnp.float32)
    w1 = 0.1 * jax.random.normal(k2, (C_out, C_in, 3, 3), dtype=jnp.float32)
    b1 = 0.1 * jax.random.normal(k3, (C_out,), dtype=jnp.float32)
    w2 = 0.1 * jax.random.normal(k4, (C_out, C_out, 3, 3), dtype=jnp.float32)
    b2 = 0.1 * jax.random.normal(k5, (C_out,), dtype=jnp.float32)

    y = double_convolution(x, w1, b1, w2, b2)
    jax.block_until_ready(y)

    y_ref = _reference(x, w1, b1, w2, b2)
    assert y.shape == (N, C_out, H, W), y.shape
    max_err = float(jnp.max(jnp.abs(y - y_ref)))
    assert jnp.allclose(y, y_ref, rtol=2e-2, atol=2e-2), max_err

    print("KERNEL_OK")
</pallas_src>

<mosaic_0001>
module attributes {stable_mosaic.version = 11 : i64} {
  func.func @_double_conv_kernel(%arg0: i32, %arg1: memref<1x4x384xf32, #tpu.memory_space<vmem>>, %arg2: memref<9x8x4xf32, #tpu.memory_space<vmem>>, %arg3: memref<8x1xf32, #tpu.memory_space<vmem>>, %arg4: memref<9x8x8xf32, #tpu.memory_space<vmem>>, %arg5: memref<8x1xf32, #tpu.memory_space<vmem>>, %arg6: memref<1x288xf32, #tpu.memory_space<vmem>>, %arg7: memref<1x8x384xf32, #tpu.memory_space<vmem>>, %arg8: memref<8x384xf32, #tpu.memory_space<vmem>>) attributes {dimension_semantics = [#tpu.dimension_semantics<parallel>], iteration_bounds = array<i64: 2>, scalar_prefetch = 0 : i64, scratch_operands = 1 : i64, tpu.core_type = #tpu.core_type<tc>, window_params = [{transform_indices = @transform_0, window_bounds = array<i64: 1, 4, 384>}, {pipeline_mode = #tpu.pipeline_mode<synchronous>, transform_indices = @transform_1, window_bounds = array<i64: 9, 8, 4>}, {pipeline_mode = #tpu.pipeline_mode<synchronous>, transform_indices = @transform_2, window_bounds = array<i64: 8, 1>}, {pipeline_mode = #tpu.pipeline_mode<synchronous>, transform_indices = @transform_3, window_bounds = array<i64: 9, 8, 8>}, {pipeline_mode = #tpu.pipeline_mode<synchronous>, transform_indices = @transform_4, window_bounds = array<i64: 8, 1>}, {pipeline_mode = #tpu.pipeline_mode<synchronous>, transform_indices = @transform_5, window_bounds = array<i64: 1, 288>}, {transform_indices = @transform_6, window_bounds = array<i64: 1, 8, 384>}]} {
    %cst = arith.constant 0.000000e+00 : f32
    %0 = vector.broadcast %cst : f32 to vector<8x288xf32>
    %c0 = arith.constant 0 : index
    %c0_0 = arith.constant 0 : index
    %c0_1 = arith.constant 0 : index
    %1 = vector.load %arg2[%c0, %c0_0, %c0_1] : memref<9x8x4xf32, #tpu.memory_space<vmem>>, vector<1x8x4xf32>
    %2 = vector.shape_cast %1 : vector<1x8x4xf32> to vector<8x4xf32>
    %c0_2 = arith.constant 0 : index
    %c0_3 = arith.constant 0 : index
    %c0_4 = arith.constant 0 : index
    %3 = vector.load %arg1[%c0_2, %c0_3, %c0_4] : memref<1x4x384xf32, #tpu.memory_space<vmem>>, vector<1x4x288xf32>
    %4 = vector.shape_cast %3 : vector<1x4x288xf32> to vector<4x288xf32>
    %cst_5 = arith.constant dense<0.000000e+00> : vector<8x288xf32>
    %5 = tpu.matmul %2, %4, %cst_5 {dimension_numbers = #tpu.dot_dimension_numbers<[1], [0], [0], [1], [0, 0, 1, 1], [], []>} : vector<8x4xf32>, vector<4x288xf32>, vector<8x288xf32> -> vector<8x288xf32>
    %6 = arith.addf %0, %5 : vector<8x288xf32>
    %c1 = arith.constant 1 : index
    %c0_6 = arith.constant 0 : index
    %c0_7 = arith.constant 0 : index
    %7 = vector.load %arg2[%c1, %c0_6, %c0_7] : memref<9x8x4xf32, #tpu.memory_space<vmem>>, vector<1x8x4xf32>
    %8 = vector.shape_cast %7 : vector<1x8x4xf32> to vector<8x4xf32>
    %c0_8 = arith.constant 0 : index
    %c0_9 = arith.constant 0 : index
    %c1_10 = arith.constant 1 : index
    %9 = vector.load %arg1[%c0_8, %c0_9, %c1_10] : memref<1x4x384xf32, #tpu.memory_space<vmem>>, vector<1x4x288xf32>
    %10 = vector.shape_cast %9 : vector<1x4x288xf32> to vector<4x288xf32>
    %cst_11 = arith.constant dense<0.000000e+00> : vector<8x288xf32>
    %11 = tpu.matmul %8, %10, %cst_11 {dimension_numbers = #tpu.dot_dimension_numbers<[1], [0], [0], [1], [0, 0, 1, 1], [], []>} : vector<8x4xf32>, vector<4x288xf32>, vector<8x288xf32> -> vector<8x288xf32>
    %12 = arith.addf %6, %11 : vector<8x288xf32>
    %c2 = arith.constant 2 : index
    %c0_12 = arith.constant 0 : index
    %c0_13 = arith.constant 0 : index
    %13 = vector.load %arg2[%c2, %c0_12, %c0_13] : memref<9x8x4xf32, #tpu.memory_space<vmem>>, vector<1x8x4xf32>
    %14 = vector.shape_cast %13 : vector<1x8x4xf32> to vector<8x4xf32>
    %c0_14 = arith.constant 0 : index
    %c0_15 = arith.constant 0 : index
    %c2_16 = arith.constant 2 : index
    %15 = vector.load %arg1[%c0_14, %c0_15, %c2_16] : memref<1x4x384xf32, #tpu.memory_space<vmem>>, vector<1x4x288xf32>
    %16 = vector.shape_cast %15 : vector<1x4x288xf32> to vector<4x288xf32>
    %cst_17 = arith.constant dense<0.000000e+00> : vector<8x288xf32>
    %17 = tpu.matmul %14, %16, %cst_17 {dimension_numbers = #tpu.dot_dimension_numbers<[1], [0], [0], [1], [0, 0, 1, 1], [], []>} : vector<8x4xf32>, vector<4x288xf32>, vector<8x288xf32> -> vector<8x288xf32>
    %18 = arith.addf %12, %17 : vector<8x288xf32>
    %c3 = arith.constant 3 : index
    %c0_18 = arith.constant 0 : index
    %c0_19 = arith.constant 0 : index
    %19 = vector.load %arg2[%c3, %c0_18, %c0_19] : memref<9x8x4xf32, #tpu.memory_space<vmem>>, vector<1x8x4xf32>
    %20 = vector.shape_cast %19 : vector<1x8x4xf32> to vector<8x4xf32>
    %c0_20 = arith.constant 0 : index
    %c0_21 = arith.constant 0 : index
    %c18 = arith.constant 18 : index
    %21 = vector.load %arg1[%c0_20, %c0_21, %c18] : memref<1x4x384xf32, #tpu.memory_space<vmem>>, vector<1x4x288xf32>
    %22 = vector.shape_cast %21 : vector<1x4x288xf32> to vector<4x288xf32>
    %cst_22 = arith.constant dense<0.000000e+00> : vector<8x288xf32>
    %23 = tpu.matmul %20, %22, %cst_22 {dimension_numbers = #tpu.dot_dimension_numbers<[1], [0], [0], [1], [0, 0, 1, 1], [], []>} : vector<8x4xf32>, vector<4x288xf32>, vector<8x288xf32> -> vector<8x288xf32>
    %24 = arith.addf %18, %23 : vector<8x288xf32>
    %c4 = arith.constant 4 : index
    %c0_23 = arith.constant 0 : index
    %c0_24 = arith.constant 0 : index
    %25 = vector.load %arg2[%c4, %c0_23, %c0_24] : memref<9x8x4xf32, #tpu.memory_space<vmem>>, vector<1x8x4xf32>
    %26 = vector.shape_cast %25 : vector<1x8x4xf32> to vector<8x4xf32>
    %c0_25 = arith.constant 0 : index
    %c0_26 = arith.constant 0 : index
    %c19 = arith.constant 19 : index
    %27 = vector.load %arg1[%c0_25, %c0_26, %c19] : memref<1x4x384xf32, #tpu.memory_space<vmem>>, vector<1x4x288xf32>
    %28 = vector.shape_cast %27 : vector<1x4x288xf32> to vector<4x288xf32>
    %cst_27 = arith.constant dense<0.000000e+00> : vector<8x288xf32>
    %29 = tpu.matmul %26, %28, %cst_27 {dimension_numbers = #tpu.dot_dimension_numbers<[1], [0], [0], [1], [0, 0, 1, 1], [], []>} : vector<8x4xf32>, vector<4x288xf32>, vector<8x288xf32> -> vector<8x288xf32>
    %30 = arith.addf %24, %29 : vector<8x288xf32>
    %c5 = arith.constant 5 : index
    %c0_28 = arith.constant 0 : index
    %c0_29 = arith.constant 0 : index
    %31 = vector.load %arg2[%c5, %c0_28, %c0_29] : memref<9x8x4xf32, #tpu.memory_space<vmem>>, vector<1x8x4xf32>
    %32 = vector.shape_cast %31 : vector<1x8x4xf32> to vector<8x4xf32>
    %c0_30 = arith.constant 0 : index
    %c0_31 = arith.constant 0 : index
    %c20 = arith.constant 20 : index
    %33 = vector.load %arg1[%c0_30, %c0_31, %c20] : memref<1x4x384xf32, #tpu.memory_space<vmem>>, vector<1x4x288xf32>
    %34 = vector.shape_cast %33 : vector<1x4x288xf32> to vector<4x288xf32>
    %cst_32 = arith.constant dense<0.000000e+00> : vector<8x288xf32>
    %35 = tpu.matmul %32, %34, %cst_32 {dimension_numbers = #tpu.dot_dimension_numbers<[1], [0], [0], [1], [0, 0, 1, 1], [], []>} : vector<8x4xf32>, vector<4x288xf32>, vector<8x288xf32> -> vector<8x288xf32>
    %36 = arith.addf %30, %35 : vector<8x288xf32>
    %c6 = arith.constant 6 : index
    %c0_33 = arith.constant 0 : index
    %c0_34 = arith.constant 0 : index
    %37 = vector.load %arg2[%c6, %c0_33, %c0_34] : memref<9x8x4xf32, #tpu.memory_space<vmem>>, vector<1x8x4xf32>
    %38 = vector.shape_cast %37 : vector<1x8x4xf32> to vector<8x4xf32>
    %c0_35 = arith.constant 0 : index
    %c0_36 = arith.constant 0 : index
    %c36 = arith.constant 36 : index
    %39 = vector.load %arg1[%c0_35, %c0_36, %c36] : memref<1x4x384xf32, #tpu.memory_space<vmem>>, vector<1x4x288xf32>
    %40 = vector.shape_cast %39 : vector<1x4x288xf32> to vector<4x288xf32>
    %cst_37 = arith.constant dense<0.000000e+00> : vector<8x288xf32>
    %41 = tpu.matmul %38, %40, %cst_37 {dimension_numbers = #tpu.dot_dimension_numbers<[1], [0], [0], [1], [0, 0, 1, 1], [], []>} : vector<8x4xf32>, vector<4x288xf32>, vector<8x288xf32> -> vector<8x288xf32>
    %42 = arith.addf %36, %41 : vector<8x288xf32>
    %c7 = arith.constant 7 : index
    %c0_38 = arith.constant 0 : index
    %c0_39 = arith.constant 0 : index
    %43 = vector.load %arg2[%c7, %c0_38, %c0_39] : memref<9x8x4xf32, #tpu.memory_space<vmem>>, vector<1x8x4xf32>
    %44 = vector.shape_cast %43 : vector<1x8x4xf32> to vector<8x4xf32>
    %c0_40 = arith.constant 0 : index
    %c0_41 = arith.constant 0 : index
    %c37 = arith.constant 37 : index
    %45 = vector.load %arg1[%c0_40, %c0_41, %c37] : memref<1x4x384xf32, #tpu.memory_space<vmem>>, vector<1x4x288xf32>
    %46 = vector.shape_cast %45 : vector<1x4x288xf32> to vector<4x288xf32>
    %cst_42 = arith.constant dense<0.000000e+00> : vector<8x288xf32>
    %47 = tpu.matmul %44, %46, %cst_42 {dimension_numbers = #tpu.dot_dimension_numbers<[1], [0], [0], [1], [0, 0, 1, 1], [], []>} : vector<8x4xf32>, vector<4x288xf32>, vector<8x288xf32> -> vector<8x288xf32>
    %48 = arith.addf %42, %47 : vector<8x288xf32>
    %c8 = arith.constant 8 : index
    %c0_43 = arith.constant 0 : index
    %c0_44 = arith.constant 0 : index
    %49 = vector.load %arg2[%c8, %c0_43, %c0_44] : memref<9x8x4xf32, #tpu.memory_space<vmem>>, vector<1x8x4xf32>
    %50 = vector.shape_cast %49 : vector<1x8x4xf32> to vector<8x4xf32>
    %c0_45 = arith.constant 0 : index
    %c0_46 = arith.constant 0 : index
    %c38 = arith.constant 38 : index
    %51 = vector.load %arg1[%c0_45, %c0_46, %c38] : memref<1x4x384xf32, #tpu.memory_space<vmem>>, vector<1x4x288xf32>
    %52 = vector.shape_cast %51 : vector<1x4x288xf32> to vector<4x288xf32>
    %cst_47 = arith.constant dense<0.000000e+00> : vector<8x288xf32>
    %53 = tpu.matmul %50, %52, %cst_47 {dimension_numbers = #tpu.dot_dimension_numbers<[1], [0], [0], [1], [0, 0, 1, 1], [], []>} : vector<8x4xf32>, vector<4x288xf32>, vector<8x288xf32> -> vector<8x288xf32>
    %54 = arith.addf %48, %53 : vector<8x288xf32>
    %c0_48 = arith.constant 0 : index
    %c0_49 = arith.constant 0 : index
    %55 = vector.load %arg3[%c0_48, %c0_49] : memref<8x1xf32, #tpu.memory_space<vmem>>, vector<8x1xf32>
    %56 = vector.broadcast %55 : vector<8x1xf32> to vector<8x288xf32>
    %57 = arith.addf %54, %56 : vector<8x288xf32>
    %cst_50 = arith.constant 0.000000e+00 : f32
    %58 = vector.broadcast %cst_50 : f32 to vector<8x288xf32>
    %59 = arith.maximumf %57, %58 : vector<8x288xf32>
    %c0_51 = arith.constant 0 : index
    %c0_52 = arith.constant 0 : index
    %60 = vector.load %arg6[%c0_51, %c0_52] : memref<1x288xf32, #tpu.memory_space<vmem>>, vector<1x288xf32>
    %61 = vector.broadcast %60 : vector<1x288xf32> to vector<8x288xf32>
    %62 = arith.mulf %59, %61 : vector<8x288xf32>
    %cst_53 = arith.constant 0.000000e+00 : f32
    %63 = vector.broadcast %cst_53 : f32 to vector<8x384xf32>
    %c0_54 = arith.constant 0 : index
    %c0_55 = arith.constant 0 : index
    %64 = vector.load %arg8[%c0_54, %c0_55] : memref<8x384xf32, #tpu.memory_space<vmem>>, vector<8x384xf32>
    tpu.vector_store %arg8[%c0_54, %c0_55], %63 {strides = array<i32>} : memref<8x384xf32, #tpu.memory_space<vmem>>, vector<8x384xf32>,
    %c0_56 = arith.constant 0 : index
    %c19_57 = arith.constant 19 : index
    %65 = vector.load %arg8[%c0_56, %c19_57] : memref<8x384xf32, #tpu.memory_space<vmem>>, vector<8x288xf32>
    tpu.vector_store %arg8[%c0_56, %c19_57], %62 {strides = array<i32>} : memref<8x384xf32, #tpu.memory_space<vmem>>, vector<8x288xf32>,
    %cst_58 = arith.constant 0.000000e+00 : f32
    %66 = vector.broadcast %cst_58 : f32 to vector<8x288xf32>
    %c0_59 = arith.constant 0 : index
    %c0_60 = arith.constant 0 : index
    %c0_61 = arith.constant 0 : index
    %67 = vector.load %arg4[%c0_59, %c0_60, %c0_61] : memref<9x8x8xf32, #tpu.memory_space<vmem>>, vector<1x8x8xf32>
    %68 = vector.shape_cast %67 : vector<1x8x8xf32> to vector<8x8xf32>
    %c0_62 = arith.constant 0 : index
    %c0_63 = arith.constant 0 : index
    %69 = vector.load %arg8[%c0_62, %c0_63] : memref<8x384xf32, #tpu.memory_space<vmem>>, vector<8x288xf32>
    %cst_64 = arith.constant dense<0.000000e+00> : vector<8x288xf32>
    %70 = tpu.matmul %68, %69, %cst_64 {dimension_numbers = #tpu.dot_dimension_numbers<[1], [0], [0], [1], [0, 0, 1, 1], [], []>} : vector<8x8xf32>, vector<8x288xf32>, vector<8x288xf32> -> vector<8x288xf32>
    %71 = arith.addf %66, %70 : vector<8x288xf32>
    %c1_65 = arith.constant 1 : index
    %c0_66 = arith.constant 0 : index
    %c0_67 = arith.constant 0 : index
    %72 = vector.load %arg4[%c1_65, %c0_66, %c0_67] : memref<9x8x8xf32, #tpu.memory_space<vmem>>, vector<1x8x8xf32>
    %73 = vector.shape_cast %72 : vector<1x8x8xf32> to vector<8x8xf32>
    %c0_68 = arith.constant 0 : index
    %c1_69 = arith.constant 1 : index
    %74 = vector.load %arg8[%c0_68, %c1_69] : memref<8x384xf32, #tpu.memory_space<vmem>>, vector<8x288xf32>
    %cst_70 = arith.constant dense<0.000000e+00> : vector<8x288xf32>
    %75 = tpu.matmul %73, %74, %cst_70 {dimension_numbers = #tpu.dot_dimension_numbers<[1], [0], [0], [1], [0, 0, 1, 1], [], []>} : vector<8x8xf32>, vector<8x288xf32>, vector<8x288xf32> -> vector<8x288xf32>
    %76 = arith.addf %71, %75 : vector<8x288xf32>
    %c2_71 = arith.constant 2 : index
    %c0_72 = arith.constant 0 : index
    %c0_73 = arith.constant 0 : index
    %77 = vector.load %arg4[%c2_71, %c0_72, %c0_73] : memref<9x8x8xf32, #tpu.memory_space<vmem>>, vector<1x8x8xf32>
    %78 = vector.shape_cast %77 : vector<1x8x8xf32> to vector<8x8xf32>
    %c0_74 = arith.constant 0 : index
    %c2_75 = arith.constant 2 : index
    %79 = vector.load %arg8[%c0_74, %c2_75] : memref<8x384xf32, #tpu.memory_space<vmem>>, vector<8x288xf32>
    %cst_76 = arith.constant dense<0.000000e+00> : vector<8x288xf32>
    %80 = tpu.matmul %78, %79, %cst_76 {dimension_numbers = #tpu.dot_dimension_numbers<[1], [0], [0], [1], [0, 0, 1, 1], [], []>} : vector<8x8xf32>, vector<8x288xf32>, vector<8x288xf32> -> vector<8x288xf32>
    %81 = arith.addf %76, %80 : vector<8x288xf32>
    %c3_77 = arith.constant 3 : index
    %c0_78 = arith.constant 0 : index
    %c0_79 = arith.constant 0 : index
    %82 = vector.load %arg4[%c3_77, %c0_78, %c0_79] : memref<9x8x8xf32, #tpu.memory_space<vmem>>, vector<1x8x8xf32>
    %83 = vector.shape_cast %82 : vector<1x8x8xf32> to vector<8x8xf32>
    %c0_80 = arith.constant 0 : index
    %c18_81 = arith.constant 18 : index
    %84 = vector.load %arg8[%c0_80, %c18_81] : memref<8x384xf32, #tpu.memory_space<vmem>>, vector<8x288xf32>
    %cst_82 = arith.constant dense<0.000000e+00> : vector<8x288xf32>
    %85 = tpu.matmul %83, %84, %cst_82 {dimension_numbers = #tpu.dot_dimension_numbers<[1], [0], [0], [1], [0, 0, 1, 1], [], []>} : vector<8x8xf32>, vector<8x288xf32>, vector<8x288xf32> -> vector<8x288xf32>
    %86 = arith.addf %81, %85 : vector<8x288xf32>
    %c4_83 = arith.constant 4 : index
    %c0_84 = arith.constant 0 : index
    %c0_85 = arith.constant 0 : index
    %87 = vector.load %arg4[%c4_83, %c0_84, %c0_85] : memref<9x8x8xf32, #tpu.memory_space<vmem>>, vector<1x8x8xf32>
    %88 = vector.shape_cast %87 : vector<1x8x8xf32> to vector<8x8xf32>
    %c0_86 = arith.constant 0 : index
    %c19_87 = arith.constant 19 : index
    %89 = vector.load %arg8[%c0_86, %c19_87] : memref<8x384xf32, #tpu.memory_space<vmem>>, vector<8x288xf32>
    %cst_88 = arith.constant dense<0.000000e+00> : vector<8x288xf32>
    %90 = tpu.matmul %88, %89, %cst_88 {dimension_numbers = #tpu.dot_dimension_numbers<[1], [0], [0], [1], [0, 0, 1, 1], [], []>} : vector<8x8xf32>, vector<8x288xf32>, vector<8x288xf32> -> vector<8x288xf32>
    %91 = arith.addf %86, %90 : vector<8x288xf32>
    %c5_89 = arith.constant 5 : index
    %c0_90 = arith.constant 0 : index
    %c0_91 = arith.constant 0 : index
    %92 = vector.load %arg4[%c5_89, %c0_90, %c0_91] : memref<9x8x8xf32, #tpu.memory_space<vmem>>, vector<1x8x8xf32>
    %93 = vector.shape_cast %92 : vector<1x8x8xf32> to vector<8x8xf32>
    %c0_92 = arith.constant 0 : index
    %c20_93 = arith.constant 20 : index
    %94 = vector.load %arg8[%c0_92, %c20_93] : memref<8x384xf32, #tpu.memory_space<vmem>>, vector<8x288xf32>
    %cst_94 = arith.constant dense<0.000000e+00> : vector<8x288xf32>
    %95 = tpu.matmul %93, %94, %cst_94 {dimension_numbers = #tpu.dot_dimension_numbers<[1], [0], [0], [1], [0, 0, 1, 1], [], []>} : vector<8x8xf32>, vector<8x288xf32>, vector<8x288xf32> -> vector<8x288xf32>
    %96 = arith.addf %91, %95 : vector<8x288xf32>
    %c6_95 = arith.constant 6 : index
    %c0_96 = arith.constant 0 : index
    %c0_97 = arith.constant 0 : index
    %97 = vector.load %arg4[%c6_95, %c0_96, %c0_97] : memref<9x8x8xf32, #tpu.memory_space<vmem>>, vector<1x8x8xf32>
    %98 = vector.shape_cast %97 : vector<1x8x8xf32> to vector<8x8xf32>
    %c0_98 = arith.constant 0 : index
    %c36_99 = arith.constant 36 : index
    %99 = vector.load %arg8[%c0_98, %c36_99] : memref<8x384xf32, #tpu.memory_space<vmem>>, vector<8x288xf32>
    %cst_100 = arith.constant dense<0.000000e+00> : vector<8x288xf32>
    %100 = tpu.matmul %98, %99, %cst_100 {dimension_numbers = #tpu.dot_dimension_numbers<[1], [0], [0], [1], [0, 0, 1, 1], [], []>} : vector<8x8xf32>, vector<8x288xf32>, vector<8x288xf32> -> vector<8x288xf32>
    %101 = arith.addf %96, %100 : vector<8x288xf32>
    %c7_101 = arith.constant 7 : index
    %c0_102 = arith.constant 0 : index
    %c0_103 = arith.constant 0 : index
    %102 = vector.load %arg4[%c7_101, %c0_102, %c0_103] : memref<9x8x8xf32, #tpu.memory_space<vmem>>, vector<1x8x8xf32>
    %103 = vector.shape_cast %102 : vector<1x8x8xf32> to vector<8x8xf32>
    %c0_104 = arith.constant 0 : index
    %c37_105 = arith.constant 37 : index
    %104 = vector.load %arg8[%c0_104, %c37_105] : memref<8x384xf32, #tpu.memory_space<vmem>>, vector<8x288xf32>
    %cst_106 = arith.constant dense<0.000000e+00> : vector<8x288xf32>
    %105 = tpu.matmul %103, %104, %cst_106 {dimension_numbers = #tpu.dot_dimension_numbers<[1], [0], [0], [1], [0, 0, 1, 1], [], []>} : vector<8x8xf32>, vector<8x288xf32>, vector<8x288xf32> -> vector<8x288xf32>
    %106 = arith.addf %101, %105 : vector<8x288xf32>
    %c8_107 = arith.constant 8 : index
    %c0_108 = arith.constant 0 : index
    %c0_109 = arith.constant 0 : index
    %107 = vector.load %arg4[%c8_107, %c0_108, %c0_109] : memref<9x8x8xf32, #tpu.memory_space<vmem>>, vector<1x8x8xf32>
    %108 = vector.shape_cast %107 : vector<1x8x8xf32> to vector<8x8xf32>
    %c0_110 = arith.constant 0 : index
    %c38_111 = arith.constant 38 : index
    %109 = vector.load %arg8[%c0_110, %c38_111] : memref<8x384xf32, #tpu.memory_space<vmem>>, vector<8x288xf32>
    %cst_112 = arith.constant dense<0.000000e+00> : vector<8x288xf32>
    %110 = tpu.matmul %108, %109, %cst_112 {dimension_numbers = #tpu.dot_dimension_numbers<[1], [0], [0], [1], [0, 0, 1, 1], [], []>} : vector<8x8xf32>, vector<8x288xf32>, vector<8x288xf32> -> vector<8x288xf32>
    %111 = arith.addf %106, %110 : vector<8x288xf32>
    %c0_113 = arith.constant 0 : index
    %c0_114 = arith.constant 0 : index
    %112 = vector.load %arg5[%c0_113, %c0_114] : memref<8x1xf32, #tpu.memory_space<vmem>>, vector<8x1xf32>
    %113 = vector.broadcast %112 : vector<8x1xf32> to vector<8x288xf32>
    %114 = arith.addf %111, %113 : vector<8x288xf32>
    %cst_115 = arith.constant 0.000000e+00 : f32
    %115 = vector.broadcast %cst_115 : f32 to vector<8x288xf32>
    %116 = arith.maximumf %114, %115 : vector<8x288xf32>
    %cst_116 = arith.constant 0.000000e+00 : f32
    %117 = vector.broadcast %cst_116 : f32 to vector<1x8x384xf32>
    %c0_117 = arith.constant 0 : index
    %c0_118 = arith.constant 0 : index
    %c0_119 = arith.constant 0 : index
    %118 = vector.load %arg7[%c0_117, %c0_118, %c0_119] : memref<1x8x384xf32, #tpu.memory_space<vmem>>, vector<1x8x384xf32>
    tpu.vector_store %arg7[%c0_117, %c0_118, %c0_119], %117 {strides = array<i32>} : memref<1x8x384xf32, #tpu.memory_space<vmem>>, vector<1x8x384xf32>,
    %c0_120 = arith.constant 0 : index
    %c0_121 = arith.constant 0 : index
    %c19_122 = arith.constant 19 : index
    %119 = vector.load %arg7[%c0_120, %c0_121, %c19_122] : memref<1x8x384xf32, #tpu.memory_space<vmem>>, vector<1x8x288xf32>
    %120 = vector.shape_cast %119 : vector<1x8x288xf32> to vector<8x288xf32>
    %121 = vector.shape_cast %116 : vector<8x288xf32> to vector<1x8x288xf32>
    tpu.vector_store %arg7[%c0_120, %c0_121, %c19_122], %121 {strides = array<i32>} : memref<1x8x384xf32, #tpu.memory_space<vmem>>, vector<1x8x288xf32>,
    return
  }
  func.func @transform_0(%arg0: i32) -> (i32, i32, i32) {
    %c0_i32 = arith.constant 0 : i32
    %c0_i32_0 = arith.constant 0 : i32
    %c0_i32_1 = arith.constant 0 : i32
    return %arg0, %c0_i32, %c0_i32_0 : i32, i32, i32
  }
  func.func @transform_1(%arg0: i32) -> (i32, i32, i32) {
    %c0_i32 = arith.constant 0 : i32
    %c0_i32_0 = arith.constant 0 : i32
    %c0_i32_1 = arith.constant 0 : i32
    %c0_i32_2 = arith.constant 0 : i32
    return %c0_i32, %c0_i32_0, %c0_i32_1 : i32, i32, i32
  }
  func.func @transform_2(%arg0: i32) -> (i32, i32) {
    %c0_i32 = arith.constant 0 : i32
    %c0_i32_0 = arith.constant 0 : i32
    %c0_i32_1 = arith.constant 0 : i32
    return %c0_i32, %c0_i32_0 : i32, i32
  }
  func.func @transform_3(%arg0: i32) -> (i32, i32, i32) {
    %c0_i32 = arith.constant 0 : i32
    %c0_i32_0 = arith.constant 0 : i32
    %c0_i32_1 = arith.constant 0 : i32
    %c0_i32_2 = arith.constant 0 : i32
    return %c0_i32, %c0_i32_0, %c0_i32_1 : i32, i32, i32
  }
  func.func @transform_4(%arg0: i32) -> (i32, i32) {
    %c0_i32 = arith.constant 0 : i32
    %c0_i32_0 = arith.constant 0 : i32
    %c0_i32_1 = arith.constant 0 : i32
    return %c0_i32, %c0_i32_0 : i32, i32
  }
  func.func @transform_5(%arg0: i32) -> (i32, i32) {
    %c0_i32 = arith.constant 0 : i32
    %c0_i32_0 = arith.constant 0 : i32
    %c0_i32_1 = arith.constant 0 : i32
    return %c0_i32, %c0_i32_0 : i32, i32
  }
  func.func @transform_6(%arg0: i32) -> (i32, i32, i32) {
    %c0_i32 = arith.constant 0 : i32
    %c0_i32_0 = arith.constant 0 : i32
    %c0_i32_1 = arith.constant 0 : i32
    return %arg0, %c0_i32, %c0_i32_0 : i32, i32, i32
  }
}

</mosaic_0001>

<bundles_post_ra>
// kernel: tpu_custom_call.1
= control target key start
LH: loop header
LB: loop body
LE: loop exit
PB: predicated region body
PF: predicated region fallthrough
CT: control target
= control target key end

     0   :  { %11 = vsyncpa [#allocation4], 0  ;;  %s4180_s0 = inlined_call_operand.vmem [shape: f32[2,4,384], index: 0, kind: input, shape index: {}]   ;;  %s4181_s1 = inlined_call_operand.vmem [shape: f32[9,8,4], index: 1, kind: input, shape index: {}]   ;;  %s4182_s2 = inlined_call_operand.vmem [shape: f32[8,1], index: 2, kind: input, shape index: {}]   ;;  %s4183_s3 = inlined_call_operand.vmem [shape: f32[9,8,8], index: 3, kind: input, shape index: {}]   ;;  %s4184_s4 = inlined_call_operand.vmem [shape: f32[8,1], index: 4, kind: input, shape index: {}]   ;;  %s4185_s5 = inlined_call_operand.vmem [shape: f32[1,288], index: 5, kind: input, shape index: {}]   ;;  %s4186_s6 = inlined_call_operand.hbm [shape: f32[2,8,384], index: 6, kind: output, shape index: {}]  }
   0x1   :  { %13 = vsyncpa [#allocation4 + $0x1], 0  ;;  %s3756_s21 = smov 0   ;;  %s3758_s22 = smov 0  }
   0x2   :  { %s3760_s23 = smov 0   ;;  %s3762_s24 = smov 0  }
   0x3 LB: > { %s3777_s25 = sadd.s32 4294967295, %s3706_s24   ;;  %s3342_s26 = sadd.s32 4294967294, %s3706_s24   ;;  %s3706_s24 = sphi %s3762_s24, %s4192_s24   ;;  %s3702_s23 = sphi %s3760_s23, %s4191_s23   ;;  %s3698_s22 = sphi %s3758_s22, %s4190_s22   ;;  %s3694_s21 = sphi %s3756_s21, %s4189_s21  }
   0x4   : > { %s3781_s27 = sadd.s32 1, %s3706_s24   ;;  %s157_s28 = sadd.s32 1, %s3702_s23 }
   0x5   : > { %s154_s29 = ssub.s32 %s3706_s24, %s3781_s27  ;;  %p167_p0 = scmp.ne.s32.totalorder %s3702_s23, %s3698_s22 }
   0x6   : > { %p155_p1 = scmp.eq.s32.totalorder %s154_s29, 0  ;;  %p168_p2 = scmp.eq.s32.totalorder %s3777_s25, 1 }
   0x7   : > { %p173_p3 = scmp.ne.s32.totalorder %s3698_s22, %s3694_s21  ;;  %p174_p4 = scmp.eq.s32.totalorder %s3342_s26, 1 }
   0x8   : > { %s3792_s30 = scalar_select %p155_p1, %s3702_s23, %s157_s28  }
   0x9   : > { %p3794_p5 = por %p168_p2, %p167_p0  ;;  %p3798_p6 = por %p174_p4, %p173_p3 }
   0xa   : > { %p3345_p7 = scmp.ge.s32.totalorder %s3706_s24, 1  ;;  %p215_p8 = scmp.lt.s32.totalorder %s3706_s24, 3 }
   0xc   : > { %p216_p9 = pnand %p3345_p7, %p215_p8 }
   0xd   : > { %p245_p10 = scmp.lt.s32.totalorder (!%p216_p9), %s3777_s25, 1  ;;  %v3708_v0 = vmov (!%p216_p9), 0.0   ;;  %vm3709_vm0 = vmmov (!%p216_p9), 0   ;;  %s3710_s14 = smov (!%p216_p9), 127   ;;  %v1752_v11 = vld [vmem:[%s4182_s2] sm:$0xff] (!%p216_p9)  ;;  %v3718_v12 = vmov (!%p216_p9), 0  }
   0xe   : > { %219 = sbr.rel (%p216_p9) target bundleno = 1093 (0x445), region = 44  ;;  %3465 = vmatprep.subr.mxu1 (!%p216_p9), %v3708_v0  ;;  %1784 = vst [vmem:[#allocation2] sm:$0xff] (!%p216_p9), %v3708_v0  ;;  %1786 = vst [vmem:[#allocation2 + $0x10] sm:$0xff] (!%p216_p9), %v3708_v0  ;;  %342 = vmatprep.mubr.f32.mxu0 (!%p216_p9), %v3708_v0  ;;  %s3711_s15 = smov (!%p216_p9), 126   ;;  %vm271_vm1 = vcmask (!%p216_p9), 1043456   ;;  %vm264_vm2 = vcmask (!%p216_p9), 1039360  }
   0xf   : > { %3467 = vmatprep.mubr.msk.f32.mxu1 (!%p216_p9), %vm3709_vm0, %v3708_v0  ;;  %s3712_s16 = smov (!%p216_p9), 110   ;;  %s3713_s17 = smov (!%p216_p9), 109   ;;  %3641 = vset.pattern.permute.xlu0 (!%p216_p9), %v3718_v12  ;;  %v3347_v18 = vld [vmem:[%s4181_s1 + $0x8] sm:$0xff] (!%p216_p9)  ;;  %vm267_vm3 = vcmask (!%p216_p9), 31744   ;;  %vm582_vm4 = vcmask (!%p216_p9), 1031168   ;;  %v250_v24 = vld [vmem:[%s4181_s1] sm:$0xff] (!%p216_p9) }
  0x10   : > { %s3714_s18 = smov (!%p216_p9), 108   ;;  %s3715_s19 = smov (!%p216_p9), 92   ;;  %3642 = vset.pattern.permute.xlu1 (!%p216_p9), %v3718_v12  ;;  %vm751_vm5 = vcmask (!%p216_p9), 900096   ;;  %v3358_v29 = vld [vmem:[%s4181_s1 + $0x10] sm:$0xff] (!%p216_p9)  ;;  %v3364_v32 = vld [vmem:[%s4181_s1 + $0x18] sm:$0xff] (!%p216_p9)  ;;  %vm920_vm6 = vcmask (!%p216_p9), 891904  }
  0x11   : > { %s3716_s20 = smov (!%p216_p9), 91   ;;  %s3717_s26 = smov (!%p216_p9), 90   ;;  %v3370_v34 = vld [vmem:[%s4181_s1 + $0x20] sm:$0xff] (!%p216_p9)  ;;  %v3376_v39 = vld [vmem:[%s4181_s1 + $0x28] sm:$0xff] (!%p216_p9)  ;;  %vm1089_vm7 = vcmask (!%p216_p9), 883712   ;;  %v3382_v46 = vld [vmem:[%s4181_s1 + $0x30] sm:$0xff] (!%p216_p9) }
  0x12   : > { %vm1258_vm8 = vcmask (!%p216_p9), 752640   ;;  %v3388_v49 = vld [vmem:[%s4181_s1 + $0x38] sm:$0xff] (!%p216_p9)  ;;  %v3394_v53 = vld [vmem:[%s4181_s1 + $0x40] sm:$0xff] (!%p216_p9)  ;;  %vm1427_vm9 = vcmask (!%p216_p9), 744448   ;;  %vm1596_vm10 = vcmask (!%p216_p9), 736256   ;;  %s3719_s29 = smov (!%p216_p9), 19  }
  0x13   : > { %vm1802_vm11 = vcmask (!%p216_p9), 1047704   ;;  %vm1796_vm12 = vcmask (!%p216_p9), 154624   ;;  %vm1805_vm13 = vcmask (!%p216_p9), 416768   ;;  %vm1827_vm14 = vcmask (!%p216_p9), 64512  }
  0x15   : > { %s246_s9 = scalar_select %p245_p10, %s3777_s25, 1 }
  0x17   : > { %s3588_s10 = smul.u32 12, %s246_s9 }
  0x19   : > { %s3813_s13 = scalar_lea.vmem %s4180_s0, %s3588_s10  ;;  %s3589_s10 = smul.u32 384, %s3777_s25 }
  0x1a   : > { %v3818_v1 = vld [vmem:[%s3813_s13] sm:$0xff]  ;;  %v3826_v3 = vld [vmem:[%s3813_s13 + $0x8] sm:$0xf] }
  0x1b   : > { %258 = vrot.lane.b32.xlu1 %v3818_v1, %s3710_s14  ;;  %v257_v2 = vcombine.high %v3818_v1, %v3818_v1  ;;  %v572_v4 = vld [vmem:[%s3813_s13 + $0x8] sm:$0xf]  ;;  %s4136_s28 = scalar_lea.hbm %s4186_s6, %s3589_s10 }
  0x1c   : > { %v741_v5 = vld [vmem:[%s3813_s13 + $0x8] sm:$0xf] }
  0x1d   : > { %260 = vrot.lane.b32.xlu0 %v257_v2, %s3710_s14  ;;  %v910_v6 = vld [vmem:[%s3813_s13 + $0x8] sm:$0xf] }
  0x1e   : > { %v1079_v7 = vld [vmem:[%s3813_s13 + $0x8] sm:$0xf] }
  0x1f   : > { %578 = vrot.lane.b32.xlu1 %v257_v2, %s3711_s15  ;;  %v1248_v8 = vld [vmem:[%s3813_s13 + $0x8] sm:$0xf] }
  0x20   : > { %v1417_v9 = vld [vmem:[%s3813_s13 + $0x8] sm:$0xf] }
  0x21   : > { %262 = vrot.lane.b32.xlu0 %v3826_v3, %s3710_s14  ;;  %v1586_v10 = vld [vmem:[%s3813_s13 + $0x8] sm:$0xf] }
  0x23   : > { %576 = vrot.lane.b32.xlu1 %v3818_v1, %s3711_s15 }
  0x25   : > { %580 = vrot.lane.b32.xlu0 %v572_v4, %s3711_s15 }
  0x27   : > { %749 = vrot.lane.b32.xlu1 %v741_v5, %s3712_s16 }
  0x29   : > { %747 = vrot.lane.b32.xlu0 %v257_v2, %s3712_s16 }
  0x2b   : > { %916 = vrot.lane.b32.xlu1 %v257_v2, %s3713_s17 }
  0x2d   : > { %745 = vrot.lane.b32.xlu0 %v3818_v1, %s3712_s16 }
  0x2f   : > { %914 = vrot.lane.b32.xlu1 %v3818_v1, %s3713_s17 }
  0x31   : > { %918 = vrot.lane.b32.xlu0 %v910_v6, %s3713_s17 }
  0x33   : > { %1087 = vrot.lane.b32.xlu1 %v1079_v7, %s3714_s18 }
  0x35   : > { %1085 = vrot.lane.b32.xlu0 %v257_v2, %s3714_s18 }
  0x37   : > { %1254 = vrot.lane.b32.xlu1 %v257_v2, %s3715_s19 }
  0x39   : > { %1083 = vrot.lane.b32.xlu0 %v3818_v1, %s3714_s18 }
  0x3b   : > { %1252 = vrot.lane.b32.xlu1 %v3818_v1, %s3715_s19 }
  0x3d   : > { %1256 = vrot.lane.b32.xlu0 %v1248_v8, %s3715_s19 }
  0x3f   : > { %1425 = vrot.lane.b32.xlu1 %v1417_v9, %s3716_s20 }
  0x41   : > { %1423 = vrot.lane.b32.xlu0 %v257_v2, %s3716_s20 }
  0x43   : > { %1592 = vrot.lane.b32.xlu1 %v257_v2, %s3717_s26 }
  0x45   : > { %1421 = vrot.lane.b32.xlu0 %v3818_v1, %s3716_s20 }
  0x47   : > { %1590 = vrot.lane.b32.xlu1 %v3818_v1, %s3717_s26 }
  0x49   : > { %1594 = vrot.lane.b32.xlu0 %v1586_v10, %s3717_s26 }
  0x4d   : > { %1755 = vperm.xlu0 %3641, %v1752_v11  }
  0x8d   : > { %v259_v13 = vpop.permute.xlu1 %258 }
  0x8f   : > { %v261_v14 = vpop.permute.xlu0 %260 }
  0x90   : > { %v265_v19 = vsel %vm264_vm2, %v259_v13, %v261_v14 }
  0x91   : > { %v579_v15 = vpop.permute.xlu1 %578 }
  0x93   : > { %v263_v16 = vpop.permute.xlu0 %262 }
  0x94   : > { %3466 = vmatpush3.msk.msra.mxu1 %vm271_vm1, %v263_v16  ;;  %v266_v17 = vsel %vm264_vm2, %v261_v14, %v263_v16 }
  0x95   : > { %3348 = vmatprep.subr.msk.mxu0 %vm271_vm1, %v266_v17  ;;  %v577_v20 = vpop.permute.xlu1 %576  ;;  %3468 = vmatmul.mubr.msk.f32.vlgmr.msra.gmra.mrb[0].mxu1 %vm267_vm3, %v3347_v18 }
  0x96   : > { %3349 = vmatpush1.msk.msra.mxu0 %vm271_vm1, %v265_v19  ;;  %3470 = vmatprep.subr.mxu1 %v3708_v0  ;;  %v583_v26 = vsel %vm582_vm4, %v577_v20, %v579_v15  ;;  %v1766_v19 = vlaneseq }
  0x97   : > { %3350 = vmatmul.mubr.msk.f32.vlgmr.msra.gmra.mrb[0].mxu0 %vm267_vm3, %v3347_v18  ;;  %3353 = vmatprep.subr.msk.mxu0 %vm271_vm1, %v257_v2  ;;  %v581_v21 = vpop.permute.xlu0 %580 }
  0x98   : > { %3354 = vmatpush1.msk.msra.mxu0 %vm271_vm1, %v3818_v1  ;;  %v584_v22 = vsel %vm582_vm4, %v579_v15, %v581_v21  ;;  %492 = vmatprep.mubr.f32.mxu0 %v3708_v0 }
  0x99   : > { %3471 = vmatpush3.msk.msra.mxu1 %vm271_vm1, %v3826_v3  ;;  %3359 = vmatprep.subr.msk.mxu0 %vm271_vm1, %v584_v22  ;;  %v750_v23 = vpop.permute.xlu1 %749 }
  0x9a   : > { %3472 = vmatprep.mubr.msk.f32.mxu1 %vm3709_vm0, %v3708_v0  ;;  %3475 = vmatprep.subr.mxu1 %v3708_v0 }
  0x9b   : > { %3473 = vmatmul.mubr.msk.f32.vlgmr.msra.gmra.mrb[2].mxu1 %vm267_vm3, %v250_v24  ;;  %v748_v25 = vpop.permute.xlu0 %747 }
  0x9c   : > { %3476 = vmatpush3.msk.msra.mxu1 %vm271_vm1, %v581_v21  ;;  %3477 = vmatprep.mubr.msk.f32.mxu1 %vm3709_vm0, %v3708_v0  ;;  %v753_v28 = vsel %vm751_vm5, %v748_v25, %v750_v23 }
  0x9d   : > { %3480 = vmatprep.subr.mxu1 %v3708_v0  ;;  %v917_v27 = vpop.permute.xlu1 %916 }
  0x9f   : > { %3355 = vmatmul.mubr.msk.f32.vlgmr.msra.gmra.mrb[0].mxu0 %vm267_vm3, %v250_v24  ;;  %v746_v30 = vpop.permute.xlu0 %745  ;;  %3478 = vmatmul.mubr.msk.f32.vlgmr.msra.gmra.mrb[4].mxu1 %vm267_vm3, %v3358_v29 }
  0xa0   : > { %3360 = vmatpush1.msk.msra.mxu0 %vm271_vm1, %v583_v26  ;;  %658 = vmatprep.mubr.f32.mxu0 %v3708_v0  ;;  %v752_v35 = vsel %vm751_vm5, %v746_v30, %v748_v25 }
  0xa1   : > { %3365 = vmatprep.subr.msk.mxu0 %vm271_vm1, %v753_v28  ;;  %3481 = vmatpush3.msk.msra.mxu1 %vm271_vm1, %v750_v23  ;;  %v915_v31 = vpop.permute.xlu1 %914  ;;  %v1767_v23 = vshrl.u32 %v1766_v19, 7 }
  0xa2   : > { %3482 = vmatprep.mubr.msk.f32.mxu1 %vm3709_vm0, %v3708_v0  ;;  %3485 = vmatprep.subr.mxu1 %v3708_v0  ;;  %v921_v42 = vsel %vm920_vm6, %v915_v31, %v917_v27 }
  0xa3   : > { %v919_v33 = vpop.permute.xlu0 %918  ;;  %3483 = vmatmul.mubr.msk.f32.vlgmr.msra.gmra.mrb[6].mxu1 %vm267_vm3, %v3364_v32  ;;  %v1776_v24 = vsub.s32 2, %v1767_v23 }
  0xa4   : > { %3486 = vmatpush3.msk.msra.mxu1 %vm271_vm1, %v919_v33  ;;  %3487 = vmatprep.mubr.msk.f32.mxu1 %vm3709_vm0, %v3708_v0  ;;  %v922_v37 = vsel %vm920_vm6, %v917_v27, %v919_v33  ;;  %v1764_v27 = vld [vmem:[%s4185_s5] sm:$0x7] }
  0xa5   : > { %v1088_v36 = vpop.permute.xlu1 %1087  ;;  %3490 = vmatprep.subr.mxu1 %v3708_v0  ;;  %v1777_v31 = vrot.slane %v1764_v27, %v1776_v24 }
  0xa7   : > { %3361 = vmatmul.mubr.msk.f32.vlgmr.msra.gmra.mrb[0].mxu0 %vm267_vm3, %v3358_v29  ;;  %v1086_v38 = vpop.permute.xlu0 %1085  ;;  %3488 = vmatmul.mubr.msk.f32.vlgmr.msra.gmra.mrb[8].mxu1 %vm267_vm3, %v3370_v34 }
  0xa8   : > { %3366 = vmatpush1.msk.msra.mxu0 %vm271_vm1, %v752_v35  ;;  %827 = vmatprep.mubr.f32.mxu0 %v3708_v0  ;;  %v1091_v44 = vsel %vm1089_vm7, %v1086_v38, %v1088_v36 }
  0xa9   : > { %3371 = vmatprep.subr.msk.mxu0 %vm271_vm1, %v922_v37  ;;  %v1255_v40 = vpop.permute.xlu1 %1254  ;;  %3491 = vmatpush3.msk.msra.mxu1 %vm271_vm1, %v1088_v36 }
  0xaa   : > { %3492 = vmatprep.mubr.msk.f32.mxu1 %vm3709_vm0, %v3708_v0  ;;  %3495 = vmatprep.subr.mxu1 %v3708_v0 }
  0xab   : > { %v1084_v41 = vpop.permute.xlu0 %1083  ;;  %3493 = vmatmul.mubr.msk.f32.vlgmr.msra.gmra.mrb[10].mxu1 %vm267_vm3, %v3376_v39 }
  0xac   : > { %3497 = vmatprep.mubr.msk.f32.mxu1 %vm3709_vm0, %v3708_v0  ;;  %v1090_v50 = vsel %vm1089_vm7, %v1084_v41, %v1086_v38 }
  0xad   : > { %v1253_v43 = vpop.permute.xlu1 %1252 }
  0xae   : > { %v1259_v55 = vsel %vm1258_vm8, %v1253_v43, %v1255_v40 }
  0xaf   : > { %3367 = vmatmul.mubr.msk.f32.vlgmr.msra.gmra.mrb[0].mxu0 %vm267_vm3, %v3364_v32  ;;  %v1257_v45 = vpop.permute.xlu0 %1256 }
  0xb0   : > { %3372 = vmatpush1.msk.msra.mxu0 %vm271_vm1, %v921_v42  ;;  %996 = vmatprep.mubr.f32.mxu0 %v3708_v0  ;;  %v1260_v51 = vsel %vm1258_vm8, %v1255_v40, %v1257_v45 }
  0xb1   : > { %3377 = vmatprep.subr.msk.mxu0 %vm271_vm1, %v1091_v44  ;;  %3496 = vmatpush3.msk.msra.mxu1 %vm271_vm1, %v1257_v45  ;;  %v1426_v47 = vpop.permute.xlu1 %1425 }
  0xb2   : > { %3498 = vmatmul.mubr.msk.f32.vlgmr.msra.gmra.mrb[12].mxu1 %vm267_vm3, %v3382_v46  ;;  %3500 = vmatprep.subr.mxu1 %v3708_v0 }
  0xb3   : > { %v1424_v48 = vpop.permute.xlu0 %1423  ;;  %3501 = vmatpush3.msk.msra.mxu1 %vm271_vm1, %v1426_v47  ;;  %3502 = vmatprep.mubr.msk.f32.mxu1 %vm3709_vm0, %v3708_v0 }
  0xb4   : > { %3505 = vmatprep.subr.mxu1 %v3708_v0  ;;  %v1429_v56 = vsel %vm1427_vm9, %v1424_v48, %v1426_v47 }
  0xb5   : > { %v1593_v57 = vpop.permute.xlu1 %1592 }
  0xb6   : > { %3503 = vmatmul.mubr.msk.f32.vlgmr.msra.gmra.mrb[14].mxu1 %vm267_vm3, %v3388_v49 }
  0xb7   : > { %3373 = vmatmul.mubr.msk.f32.vlgmr.msra.gmra.mrb[0].mxu0 %vm267_vm3, %v3370_v34  ;;  %v1422_v52 = vpop.permute.xlu0 %1421  ;;  %3507 = vmatprep.mubr.msk.f32.mxu1 %vm3709_vm0, %v3708_v0  ;;  %v1768_v34 = vsub.s32 0, %v1767_v23 }
  0xb8   : > { %3378 = vmatpush1.msk.msra.mxu0 %vm271_vm1, %v1090_v50  ;;  %1165 = vmatprep.mubr.f32.mxu0 %v3708_v0  ;;  %v1428_v58 = vsel %vm1427_vm9, %v1422_v52, %v1424_v48 }
  0xb9   : > { %3383 = vmatprep.subr.msk.mxu0 %vm271_vm1, %v1260_v51  ;;  %v1591_v60 = vpop.permute.xlu1 %1590  ;;  %v1769_v37 = vrot.slane %v1764_v27, %v1768_v34 }
  0xba   : > { %v1597_v61 = vsel %vm1596_vm10, %v1591_v60, %v1593_v57 }
  0xbb   : > { %v1595_v54 = vpop.permute.xlu0 %1594 }
  0xbc   : > { %3506 = vmatpush3.msk.msra.mxu1 %vm271_vm1, %v1595_v54  ;;  %v1598_v59 = vsel %vm1596_vm10, %v1593_v57, %v1595_v54  ;;  %v3400_v57 = vld [vmem:[%s4183_s3 + $0x8] sm:$0xff] }
  0xbd   : > { %3508 = vmatmul.mubr.msk.f32.vlgmr.msra.gmra.mrb[16].mxu1 %vm267_vm3, %v3394_v53  ;;  %3510 = vmatprep.subr.mxu1 %v3708_v0 }
  0xbe   : > { %3512 = vmatprep.mubr.msk.f32.mxu1 %vm3709_vm0, %v3708_v0 }
  0xbf   : > { %3379 = vmatmul.mubr.msk.f32.vlgmr.msra.gmra.mrb[0].mxu0 %vm267_vm3, %v3376_v39  ;;  %v1772_v39 = vsub.s32 1, %v1767_v23 }
  0xc0   : > { %3384 = vmatpush1.msk.msra.mxu0 %vm271_vm1, %v1259_v55  ;;  %1334 = vmatprep.mubr.f32.mxu0 %v3708_v0 }
  0xc1   : > { %3389 = vmatprep.subr.msk.mxu0 %vm271_vm1, %v1429_v56  ;;  %v1773_v44 = vrot.slane %v1764_v27, %v1772_v39 }
  0xc7   : > { %3385 = vmatmul.mubr.msk.f32.vlgmr.msra.gmra.mrb[0].mxu0 %vm267_vm3, %v3382_v46 }
  0xc8   : > { %3390 = vmatpush1.msk.msra.mxu0 %vm271_vm1, %v1428_v58  ;;  %1503 = vmatprep.mubr.f32.mxu0 %v3708_v0 }
  0xc9   : > { %3395 = vmatprep.subr.msk.mxu0 %vm271_vm1, %v1598_v59 }
  0xcc   : > { %v1756_v26 = vpop.permute.xlu0 %1755 }
  0xcf   : > { %3391 = vmatmul.mubr.msk.f32.vlgmr.msra.gmra.mrb[0].mxu0 %vm267_vm3, %v3388_v49 }
  0xd0   : > { %3396 = vmatpush1.msk.msra.mxu0 %vm271_vm1, %v1597_v61  ;;  %1672 = vmatprep.mubr.f32.mxu0 %v3708_v0 }
  0xd7   : > { %3397 = vmatmul.mubr.msk.f32.vlgmr.msra.gmra.mrb[0].mxu0 %vm267_vm3, %v3394_v53  ;;  %v3236_v53 = vld [vmem:[%s4184_s4] sm:$0xff] }
  0xd8   : > { %1895 = vmatprep.mubr.f32.mxu0 %v3708_v0 }
 0x168   : > { %v415_v62 = vpop.f32.mrb[0].mxu1 }
 0x169   : > { %v3469_v63 = vpop.f32.mrb[1].mxu1 }
 0x16e   : > { %v565_v1 = vpop.f32.mrb[2].mxu1 }
 0x16f   : > { %v566_v2 = vadd.f32 %v565_v1, %v415_v62  ;;  %v3474_v3 = vpop.f32.mrb[3].mxu1  ;;  %v1807_v62 = vld [vmem:[%s4183_s3] sm:$0xff] }
 0x170   : > { %v3405_v3 = vld [vmem:[%s4183_s3 + $0x10] sm:$0xff] }
 0x172   : > { %v731_v4 = vpop.f32.mrb[4].mxu1 }
 0x173   : > { %v737_v5 = vadd.f32 %v731_v4, %v566_v2  ;;  %v3479_v6 = vpop.f32.mrb[5].mxu1 }
 0x176   : > { %v900_v7 = vpop.f32.mrb[6].mxu1 }
 0x177   : > { %v906_v8 = vadd.f32 %v900_v7, %v737_v5  ;;  %v3484_v9 = vpop.f32.mrb[7].mxu1 }
 0x17a   : > { %v1069_v10 = vpop.f32.mrb[8].mxu1 }
 0x17b   : > { %v1075_v11 = vadd.f32 %v1069_v10, %v906_v8  ;;  %v3489_v12 = vpop.f32.mrb[9].mxu1  ;;  %v3408_v8 = vld [vmem:[%s4183_s3 + $0x18] sm:$0xff] }
 0x17c   : > { %v3411_v12 = vld [vmem:[%s4183_s3 + $0x20] sm:$0xff] }
 0x17e   : > { %v1238_v13 = vpop.f32.mrb[10].mxu1 }
 0x17f   : > { %v1244_v14 = vadd.f32 %v1238_v13, %v1075_v11  ;;  %v3494_v15 = vpop.f32.mrb[11].mxu1 }
 0x185   : > { %v1407_v16 = vpop.f32.mrb[12].mxu1 }
 0x186   : > { %v1413_v17 = vadd.f32 %v1407_v16, %v1244_v14  ;;  %v3499_v18 = vpop.f32.mrb[13].mxu1 }
 0x189   : > { %v1576_v20 = vpop.f32.mrb[14].mxu1 }
 0x18a   : > { %v1582_v21 = vadd.f32 %v1576_v20, %v1413_v17  ;;  %v3504_v22 = vpop.f32.mrb[15].mxu1  ;;  %v3414_v17 = vld [vmem:[%s4183_s3 + $0x28] sm:$0xff]  ;;  %v3417_v20 = vld [vmem:[%s4183_s3 + $0x30] sm:$0xff] }
 0x190   : > { %v1745_v25 = vpop.f32.mrb[16].mxu1 }
 0x191   : > { %v1751_v28 = vadd.f32 %v1745_v25, %v1582_v21  ;;  %v3509_v29 = vpop.f32.mrb[17].mxu1 }
 0x192   : > { %v3420_v29 = vld [vmem:[%s4183_s3 + $0x38] sm:$0xff] }
 0x193   : > { %v1760_v30 = vadd.f32 %v1756_v26, %v1751_v28 }
 0x195   : > { %v1763_v32 = vmax.f32 %v1760_v30, 0.0 }
 0x197   : > { %v1783_v33 = vmul.f32 %v1777_v31, %v1763_v32  ;;  %v3423_v32 = vld [vmem:[%s4183_s3 + $0x40] sm:$0xff] }
 0x199   : > { %1794 = vrot.lane.b32.xlu0 %v1783_v33, %s3719_s29 }
 0x1aa   : > { %v1674_v35 = vpop.f32.mrb[0].mxu0 }
 0x1ab   : > { %v1758_v36 = vadd.f32 %v1756_v26, %v1674_v35  ;;  %v1676_v38 = vpop.f32.mrb[1].mxu0 }
 0x1ac   : > { %v1759_v40 = vadd.f32 %v1756_v26, %v1676_v38 }
 0x1ad   : > { %v1761_v41 = vmax.f32 %v1758_v36, 0.0 }
 0x1ae   : > { %v1762_v43 = vmax.f32 %v1759_v40, 0.0 }
 0x1af   : > { %v1781_v42 = vmul.f32 %v1769_v37, %v1761_v41 }
 0x1b0   : > { %v1782_v45 = vmul.f32 %v1773_v44, %v1762_v43 }
 0x1b1   : > { %1790 = vrot.lane.b32.xlu1 %v1781_v42, %s3719_s29 }
 0x1b5   : > { %1792 = vrot.lane.b32.xlu1 %v1782_v45, %s3719_s29 }
 0x20b   : > { %v1795_v47 = vpop.permute.xlu0 %1794 }
 0x223   : > { %v1791_v46 = vpop.permute.xlu1 %1790 }
 0x224   : > { %1803 = vst.msk [vmem:[#allocation2] sm:$0xff] %vm1802_vm11, %v1791_v46 }
 0x227   : > { %v1793_v48 = vpop.permute.xlu1 %1792 }
 0x228   : > { %v1797_v49 = vsel %vm1796_vm12, %v1791_v46, %v1793_v48  ;;  %v1798_v50 = vsel %vm1796_vm12, %v1793_v48, %v1795_v47 }
 0x229   : > { %1806 = vst.msk [vmem:[#allocation2 + $0x10] sm:$0xff] %vm1805_vm13, %v1798_v50  ;;  %1818 = vrot.lane.b32.xlu1 %v1797_v49, %s3710_s14 }
 0x22b   : > { %v1808_v51 = vld [vmem:[#allocation2] sm:$0xff] }
 0x22d   : > { %1816 = vrot.lane.b32.xlu1 %v1808_v51, %s3710_s14 }
 0x230   : > { %v1810_v52 = vld [vmem:[#allocation2 + $0x10] sm:$0xff] }
 0x231   : > { %1820 = vrot.lane.b32.xlu0 %v1810_v52, %s3710_s14  ;;  %2122 = vrot.lane.b32.xlu1 %v1810_v52, %s3711_s15  ;;  %s3720_s14 = smov [#allocation3]  }
 0x235   : > { %2120 = vrot.lane.b32.xlu0 %v1797_v49, %s3711_s15  ;;  %2280 = vrot.lane.b32.xlu1 %v1797_v49, %s3712_s16 }
 0x239   : > { %2118 = vrot.lane.b32.xlu0 %v1808_v51, %s3711_s15  ;;  %2278 = vrot.lane.b32.xlu1 %v1808_v51, %s3712_s16  ;;  %s3648_s15 = sshll.u32 %s3720_s14, 4  ;;  %s3649_s15 = int_to_ptr.vmem [resolvable:$false] %s3648_s15 }
 0x23d   : > { %2282 = vrot.lane.b32.xlu0 %v1810_v52, %s3712_s16  ;;  %2442 = vrot.lane.b32.xlu1 %v1810_v52, %s3713_s17  ;;  %s3650_s16 = scalar_lea.vmem %s3649_s15, 768 }
 0x241   : > { %2440 = vrot.lane.b32.xlu0 %v1797_v49, %s3713_s17  ;;  %2600 = vrot.lane.b32.xlu1 %v1797_v49, %s3714_s18 }
 0x245   : > { %2438 = vrot.lane.b32.xlu0 %v1808_v51, %s3713_s17  ;;  %2598 = vrot.lane.b32.xlu1 %v1808_v51, %s3714_s18 }
 0x249   : > { %2602 = vrot.lane.b32.xlu0 %v1810_v52, %s3714_s18  ;;  %2762 = vrot.lane.b32.xlu1 %v1810_v52, %s3715_s19 }
 0x24d   : > { %2760 = vrot.lane.b32.xlu0 %v1797_v49, %s3715_s19  ;;  %2920 = vrot.lane.b32.xlu1 %v1797_v49, %s3716_s20 }
 0x251   : > { %2758 = vrot.lane.b32.xlu0 %v1808_v51, %s3715_s19  ;;  %2918 = vrot.lane.b32.xlu1 %v1808_v51, %s3716_s20 }
 0x255   : > { %2922 = vrot.lane.b32.xlu0 %v1810_v52, %s3716_s20  ;;  %3082 = vrot.lane.b32.xlu1 %v1810_v52, %s3717_s26  ;;  %s242_s20 = sand.u32 1, %s3698_s22  }
 0x256   : > { %s3269_s25 = scalar_lea.sflag [#allocation4], %s242_s20 }
 0x259   : > { %3080 = vrot.lane.b32.xlu0 %v1797_v49, %s3717_s26  ;;  %3239 = vperm.xlu1 %3642, %v3236_v53  }
 0x25d   : > { %3078 = vrot.lane.b32.xlu0 %v1808_v51, %s3717_s26  ;;  %s3587_s26 = smul.u32 24, %s242_s20 }
 0x25f   : > { %s244_s9 = scalar_lea.vmem [#allocation3], %s3587_s26 }
 0x260   : > { %3248 = vst [vmem:[%s244_s9] sm:$0xff] %v3708_v0  ;;  %3250 = vst [vmem:[%s244_s9 + $0x10] sm:$0xff] %v3708_v0  ;;  %s3283_s11 = sshll.u32 %s244_s9, 4  ;;  %s4138_s11 = int_to_ptr.vmem [resolvable:$true] %s3283_s11 }
 0x261   : > { %p3651_p0 = scmp.lt.s32.totalorder %s4138_s11, %s3649_s15 }
 0x29b   : > { %v1819_v54 = vpop.permute.xlu1 %1818 }
 0x29f   : > { %v1817_v55 = vpop.permute.xlu1 %1816 }
 0x2a0   : > { %v1822_v60 = vsel %vm264_vm2, %v1817_v55, %v1819_v54 }
 0x2a3   : > { %v1821_v56 = vpop.permute.xlu0 %1820  ;;  %v2123_v58 = vpop.permute.xlu1 %2122 }
 0x2a4   : > { %3511 = vmatpush3.msra.mxu1 %v1821_v56  ;;  %v1823_v59 = vsel %vm264_vm2, %v1819_v54, %v1821_v56 }
 0x2a5   : > { %1831 = vmatprep.subr.mxu0 %v1823_v59  ;;  %3515 = vmatprep.subr.mxu1 %v3708_v0 }
 0x2a6   : > { %3513 = vmatmul.mubr.msk.f32.vlgmr.msra.gmra.mrb[18].mxu1 %vm1827_vm14, %v3400_v57  ;;  %1832 = vmatpush1.msra.mxu0 %v1822_v60 }
 0x2a7   : > { %3516 = vmatpush3.msra.mxu1 %v1810_v52  ;;  %v2121_v61 = vpop.permute.xlu0 %2120  ;;  %3401 = vmatmul.mubr.msk.f32.vlgmr.msra.gmra.mrb[2].mxu0 %vm1827_vm14, %v3400_v57  ;;  %v2281_v63 = vpop.permute.xlu1 %2280 }
 0x2a8   : > { %1975 = vmatprep.subr.mxu0 %v1797_v49  ;;  %3517 = vmatprep.mubr.msk.f32.mxu1 %vm3709_vm0, %v3708_v0  ;;  %v2125_v1 = vsel %vm582_vm4, %v2121_v61, %v2123_v58 }
 0x2a9   : > { %3520 = vmatprep.subr.mxu1 %v3708_v0  ;;  %1976 = vmatpush1.msra.mxu0 %v1808_v51 }
 0x2aa   : > { %3518 = vmatmul.mubr.msk.f32.vlgmr.msra.gmra.mrb[20].mxu1 %vm1827_vm14, %v1807_v62  ;;  %2132 = vmatprep.subr.mxu0 %v2125_v1 }
 0x2ab   : > { %v2119_v2 = vpop.permute.xlu0 %2118  ;;  %3521 = vmatpush3.msra.mxu1 %v2123_v58  ;;  %3522 = vmatprep.mubr.msk.f32.mxu1 %vm3709_vm0, %v3708_v0  ;;  %v2279_v4 = vpop.permute.xlu1 %2278 }
 0x2ac   : > { %3525 = vmatprep.subr.mxu1 %v3708_v0  ;;  %2039 = vmatprep.mubr.f32.mxu0 %v3708_v0  ;;  %v2124_v5 = vsel %vm582_vm4, %v2119_v2, %v2121_v61  ;;  %v2284_v13 = vsel %vm751_vm5, %v2279_v4, %v2281_v63 }
 0x2ae   : > { %3523 = vmatmul.mubr.msk.f32.vlgmr.msra.gmra.mrb[22].mxu1 %vm1827_vm14, %v3405_v3 }
 0x2af   : > { %v2283_v6 = vpop.permute.xlu0 %2282  ;;  %3403 = vmatmul.mubr.msk.f32.vlgmr.msra.gmra.mrb[2].mxu0 %vm1827_vm14, %v1807_v62  ;;  %3527 = vmatprep.mubr.msk.f32.mxu1 %vm3709_vm0, %v3708_v0  ;;  %v2443_v7 = vpop.permute.xlu1 %2442 }
 0x2b0   : > { %3526 = vmatpush3.msra.mxu1 %v2283_v6  ;;  %2133 = vmatpush1.msra.mxu0 %v2124_v5  ;;  %v2285_v9 = vsel %vm751_vm5, %v2281_v63, %v2283_v6 }
 0x2b1   : > { %2292 = vmatprep.subr.mxu0 %v2285_v9  ;;  %3530 = vmatprep.subr.mxu1 %v3708_v0 }
 0x2b2   : > { %3528 = vmatmul.mubr.msk.f32.vlgmr.msra.gmra.mrb[24].mxu1 %vm1827_vm14, %v3408_v8  ;;  %2196 = vmatprep.mubr.f32.mxu0 %v3708_v0 }
 0x2b3   : > { %v2441_v10 = vpop.permute.xlu0 %2440  ;;  %3531 = vmatpush3.msra.mxu1 %v2443_v7  ;;  %3532 = vmatprep.mubr.msk.f32.mxu1 %vm3709_vm0, %v3708_v0  ;;  %v2601_v11 = vpop.permute.xlu1 %2600 }
 0x2b4   : > { %3535 = vmatprep.subr.mxu1 %v3708_v0  ;;  %v2445_v16 = vsel %vm920_vm6, %v2441_v10, %v2443_v7 }
 0x2b6   : > { %3533 = vmatmul.mubr.msk.f32.vlgmr.msra.gmra.mrb[26].mxu1 %vm1827_vm14, %v3411_v12 }
 0x2b7   : > { %v2439_v14 = vpop.permute.xlu0 %2438  ;;  %3406 = vmatmul.mubr.msk.f32.vlgmr.msra.gmra.mrb[2].mxu0 %vm1827_vm14, %v3405_v3  ;;  %v2599_v15 = vpop.permute.xlu1 %2598  ;;  %3537 = vmatprep.mubr.msk.f32.mxu1 %vm3709_vm0, %v3708_v0 }
 0x2b8   : > { %2293 = vmatpush1.msra.mxu0 %v2284_v13  ;;  %2356 = vmatprep.mubr.f32.mxu0 %v3708_v0  ;;  %v2444_v21 = vsel %vm920_vm6, %v2439_v14, %v2441_v10  ;;  %v2604_v27 = vsel %vm1089_vm7, %v2599_v15, %v2601_v11 }
 0x2b9   : > { %2452 = vmatprep.subr.mxu0 %v2445_v16 }
 0x2bb   : > { %v2603_v18 = vpop.permute.xlu0 %2602  ;;  %v2763_v19 = vpop.permute.xlu1 %2762 }
 0x2bc   : > { %3536 = vmatpush3.msra.mxu1 %v2603_v18  ;;  %v2605_v24 = vsel %vm1089_vm7, %v2601_v11, %v2603_v18 }
 0x2bd   : > { %3540 = vmatprep.subr.mxu1 %v3708_v0  ;;  %3538 = vmatmul.mubr.msk.f32.vlgmr.msra.gmra.mrb[28].mxu1 %vm1827_vm14, %v3414_v17 }
 0x2be   : > { %3541 = vmatpush3.msra.mxu1 %v2763_v19  ;;  %3542 = vmatprep.mubr.msk.f32.mxu1 %vm3709_vm0, %v3708_v0 }
 0x2bf   : > { %v2761_v22 = vpop.permute.xlu0 %2760  ;;  %3409 = vmatmul.mubr.msk.f32.vlgmr.msra.gmra.mrb[2].mxu0 %vm1827_vm14, %v3408_v8  ;;  %3545 = vmatprep.subr.mxu1 %v3708_v0  ;;  %v2921_v23 = vpop.permute.xlu1 %2920 }
 0x2c0   : > { %2453 = vmatpush1.msra.mxu0 %v2444_v21  ;;  %2516 = vmatprep.mubr.f32.mxu0 %v3708_v0  ;;  %v2765_v30 = vsel %vm1258_vm8, %v2761_v22, %v2763_v19 }
 0x2c1   : > { %2612 = vmatprep.subr.mxu0 %v2605_v24  ;;  %3543 = vmatmul.mubr.msk.f32.vlgmr.msra.gmra.mrb[30].mxu1 %vm1827_vm14, %v3417_v20 }
 0x2c2   : > { %3547 = vmatprep.mubr.msk.f32.mxu1 %vm3709_vm0, %v3708_v0 }
 0x2c3   : > { %v2759_v25 = vpop.permute.xlu0 %2758  ;;  %v2919_v26 = vpop.permute.xlu1 %2918 }
 0x2c4   : > { %v2764_v33 = vsel %vm1258_vm8, %v2759_v25, %v2761_v22  ;;  %v2924_v36 = vsel %vm1427_vm9, %v2919_v26, %v2921_v23 }
 0x2c7   : > { %v2923_v28 = vpop.permute.xlu0 %2922  ;;  %3412 = vmatmul.mubr.msk.f32.vlgmr.msra.gmra.mrb[2].mxu0 %vm1827_vm14, %v3411_v12  ;;  %v3083_v31 = vpop.permute.xlu1 %3082 }
 0x2c8   : > { %3546 = vmatpush3.msra.mxu1 %v2923_v28  ;;  %2613 = vmatpush1.msra.mxu0 %v2604_v27  ;;  %v2925_v34 = vsel %vm1427_vm9, %v2921_v23, %v2923_v28 }
 0x2c9   : > { %2772 = vmatprep.subr.mxu0 %v2765_v30  ;;  %3550 = vmatprep.subr.mxu1 %v3708_v0 }
 0x2ca   : > { %3548 = vmatmul.mubr.msk.f32.vlgmr.msra.gmra.mrb[32].mxu1 %vm1827_vm14, %v3420_v29  ;;  %2676 = vmatprep.mubr.f32.mxu0 %v3708_v0 }
 0x2cb   : > { %3551 = vmatpush3.msra.mxu1 %v3083_v31  ;;  %3552 = vmatprep.mubr.msk.f32.mxu1 %vm3709_vm0, %v3708_v0  ;;  %v3081_v35 = vpop.permute.xlu0 %3080 }
 0x2cc   : > { %v3085_v37 = vsel %vm1596_vm10, %v3081_v35, %v3083_v31 }
 0x2ce   : > { %3553 = vmatmul.mubr.msk.f32.vlgmr.msra.gmra.mrb[34].mxu1 %vm1827_vm14, %v3423_v32 }
 0x2cf   : > { %3415 = vmatmul.mubr.msk.f32.vlgmr.msra.gmra.mrb[2].mxu0 %vm1827_vm14, %v3414_v17  ;;  %v3079_v38 = vpop.permute.xlu0 %3078 }
 0x2d0   : > { %2773 = vmatpush1.msra.mxu0 %v2764_v33  ;;  %2836 = vmatprep.mubr.f32.mxu0 %v3708_v0  ;;  %v3084_v39 = vsel %vm1596_vm10, %v3079_v38, %v3081_v35 }
 0x2d1   : > { %2932 = vmatprep.subr.mxu0 %v2925_v34 }
 0x2d7   : > { %3418 = vmatmul.mubr.msk.f32.vlgmr.msra.gmra.mrb[2].mxu0 %vm1827_vm14, %v3417_v20 }
 0x2d8   : > { %2933 = vmatpush1.msra.mxu0 %v2924_v36  ;;  %2996 = vmatprep.mubr.f32.mxu0 %v3708_v0  ;;  %v3240_v3 = vpop.permute.xlu1 %3239 }
 0x2d9   : > { %3092 = vmatprep.subr.mxu0 %v3085_v37 }
 0x2df   : > { %3421 = vmatmul.mubr.msk.f32.vlgmr.msra.gmra.mrb[2].mxu0 %vm1827_vm14, %v3420_v29 }
 0x2e0   : > { %3093 = vmatpush1.msra.mxu0 %v3084_v39  ;;  %3156 = vmatprep.mubr.f32.mxu0 %v3708_v0 }
 0x2e7   : > { %3424 = vmatmul.mubr.msk.f32.vlgmr.msra.gmra.mrb[2].mxu0 %vm1827_vm14, %v3423_v32 }
 0x379   : > { %v1968_v40 = vpop.f32.mrb[18].mxu1 }
 0x37a   : > { %v3514_v41 = vpop.f32.mrb[19].mxu1 }
 0x37d   : > { %v2112_v42 = vpop.f32.mrb[20].mxu1 }
 0x37e   : > { %v2113_v43 = vadd.f32 %v2112_v42, %v1968_v40  ;;  %v3519_v44 = vpop.f32.mrb[21].mxu1 }
 0x381   : > { %v2269_v45 = vpop.f32.mrb[22].mxu1 }
 0x382   : > { %v2275_v46 = vadd.f32 %v2269_v45, %v2113_v43  ;;  %v3524_v47 = vpop.f32.mrb[23].mxu1 }
 0x385   : > { %v2429_v48 = vpop.f32.mrb[24].mxu1 }
 0x386   : > { %v2435_v49 = vadd.f32 %v2429_v48, %v2275_v46  ;;  %v3529_v50 = vpop.f32.mrb[25].mxu1 }
 0x389   : > { %v2589_v51 = vpop.f32.mrb[26].mxu1 }
 0x38a   : > { %v2595_v52 = vadd.f32 %v2589_v51, %v2435_v49  ;;  %v3534_v53 = vpop.f32.mrb[27].mxu1 }
 0x390   : > { %v2749_v54 = vpop.f32.mrb[28].mxu1 }
 0x391   : > { %v2755_v55 = vadd.f32 %v2749_v54, %v2595_v52  ;;  %v3539_v56 = vpop.f32.mrb[29].mxu1 }
 0x394   : > { %v2909_v57 = vpop.f32.mrb[30].mxu1 }
 0x395   : > { %v2915_v58 = vadd.f32 %v2909_v57, %v2755_v55  ;;  %v3544_v59 = vpop.f32.mrb[31].mxu1 }
 0x39d   : > { %v3069_v60 = vpop.f32.mrb[32].mxu1 }
 0x39e   : > { %v3075_v61 = vadd.f32 %v3069_v60, %v2915_v58  ;;  %v3549_v62 = vpop.f32.mrb[33].mxu1 }
 0x3a1   : > { %v3229_v63 = vpop.f32.mrb[34].mxu1 }
 0x3a2   : > { %v3235_v1 = vadd.f32 %v3229_v63, %v3075_v61  ;;  %v3554_v2 = vpop.f32.mrb[35].mxu1 }
 0x3a4   : > { %v3244_v8 = vadd.f32 %v3240_v3, %v3235_v1 }
 0x3a6   : > { %v3247_v11 = vmax.f32 %v3244_v8, 0.0 }
 0x3ba   : > { %v3158_v4 = vpop.f32.mrb[2].mxu0 }
 0x3bb   : > { %v3242_v5 = vadd.f32 %v3240_v3, %v3158_v4  ;;  %v3160_v6 = vpop.f32.mrb[3].mxu0 }
 0x3bc   : > { %v3243_v7 = vadd.f32 %v3240_v3, %v3160_v6 }
 0x3bd   : > { %v3245_v9 = vmax.f32 %v3242_v5, 0.0 }
 0x3be   : > { %v3246_v10 = vmax.f32 %v3243_v7, 0.0 }
 0x3bf   : > { %3254 = vrot.lane.b32.xlu0 %v3245_v9, %s3719_s29 }
 0x3c0   : > { %3256 = vrot.lane.b32.xlu1 %v3246_v10, %s3719_s29 }
 0x3c3   : > { %3258 = vrot.lane.b32.xlu0 %v3247_v11, %s3719_s29  ;;  %s3644_s29 = scalar_lea.vmem %s4138_s11, 384 }
 0x3c4   : > { %p3645_p11 = scmp.ne.s32.totalorder %s4138_s11, %s3644_s29  ;;  %p3652_p1 = scmp.lt.s32.totalorder %s3650_s16, %s3644_s29 }
 0x3c6   : > { %p3646_p12 = pnand %p3645_p11, %p3794_p5  ;;  %p3653_p2 = por %p3652_p1, %p3651_p0 }
 0x3c8   : > { %p3647_p13 = pneg %p3646_p12 }
 0x3ca   : > { %p3654_p3 = pnand %p3653_p2, %p3647_p13 }
 0x431   : > { %v3255_v12 = vpop.permute.xlu0 %3254 }
 0x432   : > { %3265 = vst.msk [vmem:[%s244_s9] sm:$0xff] %vm1802_vm11, %v3255_v12  ;;  %v3257_v0 = vpop.permute.xlu1 %3256 }
 0x433   : > { %v3260_v13 = vsel %vm1796_vm12, %v3255_v12, %v3257_v0 }
 0x434   : > { %3266 = vst [vmem:[%s244_s9 + $0x8] sm:$0xff] %v3260_v13 }
 0x435   : > { %v3259_v14 = vpop.permute.xlu0 %3258 }
 0x436   : > { %v3261_v15 = vsel %vm1796_vm12, %v3257_v0, %v3259_v14 }
 0x437   : > { %3267 = vst.msk [vmem:[%s244_s9 + $0x10] sm:$0xff] %vm1805_vm13, %v3261_v15 }
 0x438   : > { %3657 = shalt.err (!%p3654_p3)
}
 0x439   : > { %s3658_s17 = scalar_lea.hbm %s4136_s28, 384  ;;  %s3662_s20 = scalar_lea.hbm %s4186_s6, 768 }
 0x43a   : > { %p3659_p4 = scmp.ne.s32.totalorder %s4136_s28, %s3658_s17  ;;  %p3663_p9 = scmp.lt.u32.totalorder %s4136_s28, %s4186_s6 }
 0x43b   : > { %p3664_p10 = scmp.lt.u32.totalorder %s3662_s20, %s3658_s17  ;;  %p3666_p12 = scmp.lt.u32.totalorder %s3658_s17, %s4136_s28 }
 0x43c   : > { %p3660_p7 = pnand %p3659_p4, %p3794_p5 }
 0x43d   : > { %p3665_p11 = por %p3664_p10, %p3663_p9 }
 0x43e   : > { %p3661_p8 = pneg %p3660_p7 }
 0x43f   : > { %p3667_p13 = por %p3666_p12, %p3665_p11 }
 0x441   : > { %p3668_p0 = pnand %p3667_p13, %p3661_p8 }
 0x443   : > { %3671 = shalt.err (!%p3668_p0)
}
 0x444   : > { %3590 = dma.vmem_to_hbm [thread:$0]  (%p3794_p5), %s4138_s11, 384, %s4136_s28, %s3269_s25  }
 0x445 PF: > { %p3596_p1 = scmp.ge.s32.totalorder %s3706_s24, 2  ;;  %s3295_s10 = sand.u32 1, %s3694_s21  }
 0x446   : > { %s3296_s12 = scalar_lea.sflag [#allocation4], %s3295_s10 }
 0x447   : > { %p3593_p2 = pnand %p3596_p1, %p3798_p6 }
 0x449   : > { %3689 = dma.done.wait (!%p3593_p2), %s3296_s12, 384  }
 0x44a   : > { %3691 = vsyncadd (!%p3593_p2), %s3296_s12, 4294966912  ;;  %p16_p3 = scmp.ge.s32.totalorder %s3781_s27, 4   ;;  %s4189_s21 = smov %s3698_s22 }
 0x44b   : > { %s4190_s22 = smov %s3702_s23  ;;  %s4191_s23 = smov %s3792_s30 }
 0x44c   : > { %s4192_s24 = smov %s3781_s27  ;;  %18 = sbr.rel (!%p16_p3) target bundleno = 3 (0x3), region = 95 }
 0x453   :  { %3301 = vsyncpa [#allocation4], 1 }
 0x454   :  { %3303 = vsyncpa [#allocation4 + $0x1], 1 }

</bundles_post_ra>
